<compile_context>
chip_gen: v6e
topology: v6e:2x2x1
jax: 0.10.0
libtpu: 0.0.40
codegen_flags: <defaults>
</compile_context>

<pallas_src>
import jax
import jax.numpy as jnp
from jax import lax
from jax.experimental import pallas as pl
from jax.experimental.pallas import tpu as pltpu

NEG_SLOPE = 0.01        # F.leaky_relu default
NEG_INF = -1e30


def gat_kernel(h_ref, w_ref, a_src_ref, a_dst_ref, adjt_ref, out_ref):
    # Per-graph block shapes (leading batch dim squeezed away by the BlockSpecs):
    #   h_ref    : [N, Din]
    #   w_ref    : [Din, Dp]   fc.weight.T zero-padded to lane-dense Dp (multiple of 128)
    #   a_src_ref: [1, Dp]     first half of attn_fc weight (src part), zero-padded
    #   a_dst_ref: [Dp, 1]     second half of attn_fc weight (dst part), zero-padded
    #   adjt_ref : [N, N]      adj_t[dst, src] = 1  <=>  edge src -> dst
    #   out_ref  : [N, Dp]
    h = h_ref[...]
    w = w_ref[...]

    # z = fc(h)  (MXU).  Padded columns of w are zero -> padded columns of z are zero.
    z = jnp.dot(h, w, preferred_element_type=jnp.float32)                    # [N, Dp]

    # Attention logits e[dst, src] = z[src].a_src + z[dst].a_dst.
    # Both terms come from z via tiny MXU dots; the src term uses a trans-b
    # contraction so no transposed copy of z (or h/W) is ever materialized.
    s_dst = jnp.dot(z, a_dst_ref[...], preferred_element_type=jnp.float32)   # [N, 1]
    s_src = lax.dot_general(a_src_ref[...], z,
                            dimension_numbers=(((1,), (1,)), ((), ())),
                            preferred_element_type=jnp.float32)              # [1, N]
    e = s_dst + s_src                                                        # [N, N]
    e = jnp.where(e > 0, e, NEG_SLOPE * e)                                   # leaky_relu

    # Masked softmax over incoming edges (last axis = src).  Masked entries get -1e30;
    # exp(-1e30 - m) underflows to exactly 0, so no second select is needed.
    e = jnp.where(adjt_ref[...] > 0, e, NEG_INF)
    m = jnp.max(e, axis=-1, keepdims=True)                                   # [N, 1]
    p = jnp.exp(e - m)                                                       # [N, N]
    denom = jnp.sum(p, axis=-1, keepdims=True)                               # [N, 1]
    # Guard zero in-degree rows (driver adds self-loops, but stay NaN-free regardless).
    denom = jnp.maximum(denom, 1e-30)

    # out[dst] = sum_src alpha * z[src]; normalize AFTER the matmul on the small
    # [N, Dp] accumulator instead of scaling the [N, N] attention matrix.
    acc = jnp.dot(p, z, preferred_element_type=jnp.float32)                  # [N, Dp]
    inv = pl.reciprocal(denom, approx=False)    # exact: keeps 1e-4 rtol vs reference
    out_ref[...] = (acc * inv).astype(out_ref.dtype)


def gat_layer_forward(node_features, adj, fc_weight, attn_weight):
    """NodeLevelGAT forward over a batch of dense graphs.

    node_features: [B, N, Din] (or [N, Din])
    adj:           [B, N, N]   (or [N, N]); adj[..., i, j] = 1 iff edge src i -> dst j
    fc_weight:     [Dout, Din]   (PyTorch nn.Linear layout)
    attn_weight:   [1, 2*Dout]
    returns:       [B, N, Dout] (or [N, Dout])
    """
    single = node_features.ndim == 2
    if single:
        node_features = node_features[None]
        adj = adj[None]
    B, N, Din = node_features.shape
    Dout = fc_weight.shape[0]
    Dp = ((Dout + 127) // 128) * 128          # lane-dense padded output width (>=128)

    h = node_features.astype(jnp.float32)
    w = jnp.zeros((Din, Dp), jnp.float32).at[:, :Dout].set(
        fc_weight.T.astype(jnp.float32))
    a_src = jnp.zeros((1, Dp), jnp.float32).at[0, :Dout].set(
        attn_weight[0, :Dout].astype(jnp.float32))
    a_dst = jnp.zeros((Dp, 1), jnp.float32).at[:Dout, 0].set(
        attn_weight[0, Dout:].astype(jnp.float32))
    adj_t = jnp.swapaxes(adj, -1, -2).astype(jnp.float32)     # [B, dst, src]

    out_pad = pl.pallas_call(
        gat_kernel,
        out_shape=jax.ShapeDtypeStruct((B, N, Dp), jnp.float32),
        grid=(B,),
        in_specs=[
            pl.BlockSpec((None, N, Din), lambda b: (b, 0, 0)),   # per-graph features
            pl.BlockSpec((Din, Dp),      lambda b: (0, 0)),      # shared fc weight
            pl.BlockSpec((1, Dp),        lambda b: (0, 0)),      # shared attn src vec
            pl.BlockSpec((Dp, 1),        lambda b: (0, 0)),      # shared attn dst vec
            pl.BlockSpec((None, N, N),   lambda b: (b, 0, 0)),   # per-graph adjacency
        ],
        out_specs=pl.BlockSpec((None, N, Dp), lambda b: (b, 0, 0)),
        compiler_params=pltpu.CompilerParams(
            dimension_semantics=("parallel",)),                  # shard graphs over TCs
    )(h, w, a_src, a_dst, adj_t)

    out = out_pad[..., :Dout]
    return out[0] if single else out


def gat_layer_ref(node_features, adj, fc_weight, attn_weight):
    """Pure-JAX reference mirroring the DGL/PyTorch forward (batched)."""
    z = node_features @ fc_weight.T                             # [B, N, Dout]
    Dout = z.shape[-1]
    a_src = attn_weight[0, :Dout]
    a_dst = attn_weight[0, Dout:]
    e = (z @ a_src)[..., :, None] + (z @ a_dst)[..., None, :]   # e[b, src, dst]
    e = jnp.where(e > 0, e, NEG_SLOPE * e)
    mask = adj > 0
    e = jnp.where(mask, e, NEG_INF)
    m = jnp.max(e, axis=-2, keepdims=True)
    p = jnp.where(mask, jnp.exp(e - m), 0.0)
    alpha = p / jnp.sum(p, axis=-2, keepdims=True)              # softmax over src per dst
    return jnp.einsum('bij,bio->bjo', alpha, z)                 # out[b, dst, :]


if __name__ == "__main__":
    # 2 small graphs, node_ft_dim=32, z_node_lv_dim=32 (matches module __init__ shapes).
    B, N, Din, Dout = 2, 64, 32, 32

    key = jax.random.PRNGKey(0)
    k_h, k_w, k_a, k_adj = jax.random.split(key, 4)

    node_features = jax.random.normal(k_h, (B, N, Din), dtype=jnp.float32)
    fc_weight   = 0.1 * jax.random.normal(k_w, (Dout, Din), dtype=jnp.float32)
    attn_weight = 0.1 * jax.random.normal(k_a, (1, 2 * Dout), dtype=jnp.float32)

    # Synthetic DGL-style graphs as dense adjacencies (src -> dst); self-loops added so
    # every node has at least one incoming edge (matches DGL's per-mailbox softmax).
    adj = jax.random.bernoulli(k_adj, 0.25, (B, N, N)).astype(jnp.float32)
    adj = jnp.maximum(adj, jnp.eye(N, dtype=jnp.float32)[None])

    out = gat_layer_forward(node_features, adj, fc_weight, attn_weight)
    out = jax.block_until_ready(out)

    ref = gat_layer_ref(node_features, adj, fc_weight, attn_weight)
    assert out.shape == (B, N, Dout)
    assert jnp.allclose(out, ref, rtol=1e-4, atol=1e-4), "mismatch vs reference"

    # TODO(synk): the DGL graph object held in __init__ (self.g) is modeled as a dense
    # adjacency mask; arbitrary sparse edge lists would need a gather/DMA-based kernel.
    print("KERNEL_OK")
</pallas_src>

<mosaic_0001>
module attributes {stable_mosaic.version = 11 : i64} {
  func.func @gat_kernel(%arg0: i32, %arg1: memref<1x64x32xf32, #tpu.memory_space<vmem>>, %arg2: memref<32x128xf32, #tpu.memory_space<vmem>>, %arg3: memref<1x128xf32, #tpu.memory_space<vmem>>, %arg4: memref<128x1xf32, #tpu.memory_space<vmem>>, %arg5: memref<1x64x64xf32, #tpu.memory_space<vmem>>, %arg6: memref<1x64x128xf32, #tpu.memory_space<vmem>>) attributes {dimension_semantics = [#tpu.dimension_semantics<parallel>], iteration_bounds = array<i64: 2>, scalar_prefetch = 0 : i64, scratch_operands = 0 : i64, tpu.core_type = #tpu.core_type<tc>, window_params = [{transform_indices = @transform_0, window_bounds = array<i64: 1, 64, 32>}, {pipeline_mode = #tpu.pipeline_mode<synchronous>, transform_indices = @transform_1, window_bounds = array<i64: 32, 128>}, {pipeline_mode = #tpu.pipeline_mode<synchronous>, transform_indices = @transform_2, window_bounds = array<i64: 1, 128>}, {pipeline_mode = #tpu.pipeline_mode<synchronous>, transform_indices = @transform_3, window_bounds = array<i64: 128, 1>}, {transform_indices = @transform_4, window_bounds = array<i64: 1, 64, 64>}, {transform_indices = @transform_5, window_bounds = array<i64: 1, 64, 128>}]} {
    %c0 = arith.constant 0 : index
    %c0_0 = arith.constant 0 : index
    %c0_1 = arith.constant 0 : index
    %0 = vector.load %arg1[%c0, %c0_0, %c0_1] : memref<1x64x32xf32, #tpu.memory_space<vmem>>, vector<1x64x32xf32>
    %1 = vector.shape_cast %0 : vector<1x64x32xf32> to vector<64x32xf32>
    %c0_2 = arith.constant 0 : index
    %c0_3 = arith.constant 0 : index
    %2 = vector.load %arg2[%c0_2, %c0_3] : memref<32x128xf32, #tpu.memory_space<vmem>>, vector<32x128xf32>
    %cst = arith.constant dense<0.000000e+00> : vector<64x128xf32>
    %3 = tpu.matmul %1, %2, %cst {dimension_numbers = #tpu.dot_dimension_numbers<[1], [0], [0], [1], [0, 0, 1, 1], [], []>} : vector<64x32xf32>, vector<32x128xf32>, vector<64x128xf32> -> vector<64x128xf32>
    %c0_4 = arith.constant 0 : index
    %c0_5 = arith.constant 0 : index
    %4 = vector.load %arg4[%c0_4, %c0_5] : memref<128x1xf32, #tpu.memory_space<vmem>>, vector<128x1xf32>
    %cst_6 = arith.constant dense<0.000000e+00> : vector<64x1xf32>
    %5 = tpu.matmul %3, %4, %cst_6 {dimension_numbers = #tpu.dot_dimension_numbers<[1], [0], [0], [1], [0, 0, 1, 1], [], []>} : vector<64x128xf32>, vector<128x1xf32>, vector<64x1xf32> -> vector<64x1xf32>
    %c0_7 = arith.constant 0 : index
    %c0_8 = arith.constant 0 : index
    %6 = vector.load %arg3[%c0_7, %c0_8] : memref<1x128xf32, #tpu.memory_space<vmem>>, vector<1x128xf32>
    %cst_9 = arith.constant dense<0.000000e+00> : vector<1x64xf32>
    %7 = tpu.matmul %6, %3, %cst_9 {dimension_numbers = #tpu.dot_dimension_numbers<[1], [1], [0], [0], [0, 0, 1, 0], [], []>} : vector<1x128xf32>, vector<64x128xf32>, vector<1x64xf32> -> vector<1x64xf32>
    %8 = vector.broadcast %5 : vector<64x1xf32> to vector<64x64xf32>
    %9 = vector.broadcast %7 : vector<1x64xf32> to vector<64x64xf32>
    %10 = arith.addf %8, %9 : vector<64x64xf32>
    %cst_10 = arith.constant 0.000000e+00 : f32
    %11 = vector.broadcast %cst_10 : f32 to vector<64x64xf32>
    %12 = arith.cmpf ogt, %10, %11 : vector<64x64xf32>
    %cst_11 = arith.constant 0.00999999977 : f32
    %13 = vector.broadcast %cst_11 : f32 to vector<64x64xf32>
    %14 = arith.mulf %13, %10 : vector<64x64xf32>
    %15 = arith.select %12, %10, %14 : vector<64x64xi1>, vector<64x64xf32>
    %c0_12 = arith.constant 0 : index
    %c0_13 = arith.constant 0 : index
    %c0_14 = arith.constant 0 : index
    %16 = vector.load %arg5[%c0_12, %c0_13, %c0_14] : memref<1x64x64xf32, #tpu.memory_space<vmem>>, vector<1x64x64xf32>
    %17 = vector.shape_cast %16 : vector<1x64x64xf32> to vector<64x64xf32>
    %cst_15 = arith.constant 0.000000e+00 : f32
    %18 = vector.broadcast %cst_15 : f32 to vector<64x64xf32>
    %19 = arith.cmpf ogt, %17, %18 : vector<64x64xf32>
    %cst_16 = arith.constant -1.000000e+30 : f32
    %20 = vector.broadcast %cst_16 : f32 to vector<64x64xf32>
    %21 = arith.select %19, %15, %20 : vector<64x64xi1>, vector<64x64xf32>
    %cst_17 = arith.constant dense<0xFF800000> : vector<64xf32>
    %22 = vector.multi_reduction <maximumf>, %21, %cst_17 [1] : vector<64x64xf32> to vector<64xf32>
    %23 = vector.shape_cast %22 : vector<64xf32> to vector<64x1xf32>
    %24 = vector.broadcast %23 : vector<64x1xf32> to vector<64x64xf32>
    %25 = arith.subf %21, %24 : vector<64x64xf32>
    %26 = math.exp %25 : vector<64x64xf32>
    %cst_18 = arith.constant dense<0.000000e+00> : vector<64xf32>
    %27 = vector.multi_reduction <add>, %26, %cst_18 [1] : vector<64x64xf32> to vector<64xf32>
    %28 = vector.shape_cast %27 : vector<64xf32> to vector<64x1xf32>
    %cst_19 = arith.constant 1.000000e-30 : f32
    %29 = vector.broadcast %cst_19 : f32 to vector<64x1xf32>
    %30 = arith.maximumf %28, %29 : vector<64x1xf32>
    %cst_20 = arith.constant dense<0.000000e+00> : vector<64x128xf32>
    %31 = tpu.matmul %26, %3, %cst_20 {dimension_numbers = #tpu.dot_dimension_numbers<[1], [0], [0], [1], [0, 0, 1, 1], [], []>} : vector<64x64xf32>, vector<64x128xf32>, vector<64x128xf32> -> vector<64x128xf32>
    %32 = tpu.reciprocal %30 : vector<64x1xf32> -> vector<64x1xf32>
    %33 = vector.broadcast %32 : vector<64x1xf32> to vector<64x128xf32>
    %34 = arith.mulf %31, %33 : vector<64x128xf32>
    %c0_21 = arith.constant 0 : index
    %c0_22 = arith.constant 0 : index
    %c0_23 = arith.constant 0 : index
    %35 = vector.load %arg6[%c0_21, %c0_22, %c0_23] : memref<1x64x128xf32, #tpu.memory_space<vmem>>, vector<1x64x128xf32>
    %36 = vector.shape_cast %35 : vector<1x64x128xf32> to vector<64x128xf32>
    %37 = vector.shape_cast %34 : vector<64x128xf32> to vector<1x64x128xf32>
    tpu.vector_store %arg6[%c0_21, %c0_22, %c0_23], %37 {strides = array<i32>} : memref<1x64x128xf32, #tpu.memory_space<vmem>>, vector<1x64x128xf32>,
    return
  }
  func.func @transform_0(%arg0: i32) -> (i32, i32, i32) {
    %c0_i32 = arith.constant 0 : i32
    %c0_i32_0 = arith.constant 0 : i32
    %c0_i32_1 = arith.constant 0 : i32
    return %arg0, %c0_i32, %c0_i32_0 : i32, i32, i32
  }
  func.func @transform_1(%arg0: i32) -> (i32, i32) {
    %c0_i32 = arith.constant 0 : i32
    %c0_i32_0 = arith.constant 0 : i32
    %c0_i32_1 = arith.constant 0 : i32
    return %c0_i32, %c0_i32_0 : i32, i32
  }
  func.func @transform_2(%arg0: i32) -> (i32, i32) {
    %c0_i32 = arith.constant 0 : i32
    %c0_i32_0 = arith.constant 0 : i32
    %c0_i32_1 = arith.constant 0 : i32
    return %c0_i32, %c0_i32_0 : i32, i32
  }
  func.func @transform_3(%arg0: i32) -> (i32, i32) {
    %c0_i32 = arith.constant 0 : i32
    %c0_i32_0 = arith.constant 0 : i32
    %c0_i32_1 = arith.constant 0 : i32
    return %c0_i32, %c0_i32_0 : i32, i32
  }
  func.func @transform_4(%arg0: i32) -> (i32, i32, i32) {
    %c0_i32 = arith.constant 0 : i32
    %c0_i32_0 = arith.constant 0 : i32
    %c0_i32_1 = arith.constant 0 : i32
    return %arg0, %c0_i32, %c0_i32_0 : i32, i32, i32
  }
  func.func @transform_5(%arg0: i32) -> (i32, i32, i32) {
    %c0_i32 = arith.constant 0 : i32
    %c0_i32_0 = arith.constant 0 : i32
    %c0_i32_1 = arith.constant 0 : i32
    return %arg0, %c0_i32, %c0_i32_0 : i32, i32, i32
  }
}

</mosaic_0001>

<bundles_post_ra>
// kernel: tpu_custom_call.1
= control target key start
LH: loop header
LB: loop body
LE: loop exit
PB: predicated region body
PF: predicated region fallthrough
CT: control target
= control target key end

     0   :  { %10 = vsyncpa [#allocation3], 0  ;;  %s1646_s0 = inlined_call_operand.vmem [shape: f32[2,64,32], index: 0, kind: input, shape index: {}]   ;;  %s1647_s1 = inlined_call_operand.vmem [shape: f32[32,128], index: 1, kind: input, shape index: {}]   ;;  %s1648_s2 = inlined_call_operand.vmem [shape: f32[1,128], index: 2, kind: input, shape index: {}]   ;;  %s1649_s3 = inlined_call_operand.vmem [shape: f32[128,1], index: 3, kind: input, shape index: {}]   ;;  %s1650_s4 = inlined_call_operand.vmem [shape: f32[2,64,64], index: 4, kind: input, shape index: {}]   ;;  %s1651_s5 = inlined_call_operand.hbm [shape: f32[2,64,128], index: 5, kind: output, shape index: {}]  }
   0x1   :  { %12 = vsyncpa [#allocation3 + $0x1], 0  ;;  %s1396_s18 = smov 0   ;;  %s1398_s19 = smov 0  }
   0x2   :  { %s1400_s20 = smov 0   ;;  %s1402_s21 = smov 0  }
   0x3 LB: > { %s1417_s22 = sadd.s32 4294967295, %s1358_s21   ;;  %s999_s23 = sadd.s32 4294967294, %s1358_s21   ;;  %s1358_s21 = sphi %s1402_s21, %s1657_s21   ;;  %s1354_s20 = sphi %s1400_s20, %s1656_s20   ;;  %s1350_s19 = sphi %s1398_s19, %s1655_s19   ;;  %s1346_s18 = sphi %s1396_s18, %s1654_s18  }
   0x4   : > { %s1421_s24 = sadd.s32 1, %s1358_s21   ;;  %s140_s25 = sadd.s32 1, %s1354_s20 }
   0x5   : > { %s137_s26 = ssub.s32 %s1358_s21, %s1421_s24  ;;  %p150_p0 = scmp.ne.s32.totalorder %s1354_s20, %s1350_s19 }
   0x6   : > { %p138_p1 = scmp.eq.s32.totalorder %s137_s26, 0  ;;  %p151_p2 = scmp.eq.s32.totalorder %s1417_s22, 1 }
   0x7   : > { %p156_p3 = scmp.ne.s32.totalorder %s1350_s19, %s1346_s18  ;;  %p157_p4 = scmp.eq.s32.totalorder %s999_s23, 1 }
   0x8   : > { %s1432_s27 = scalar_select %p138_p1, %s1354_s20, %s140_s25  }
   0x9   : > { %p1434_p5 = por %p151_p2, %p150_p0  ;;  %p1438_p6 = por %p157_p4, %p156_p3 }
   0xa   : > { %p1002_p7 = scmp.ge.s32.totalorder %s1358_s21, 1  ;;  %p200_p8 = scmp.lt.s32.totalorder %s1358_s21, 3 }
   0xc   : > { %p201_p9 = pnand %p1002_p7, %p200_p8 }
   0xd   : > { %p233_p10 = scmp.lt.s32.totalorder (!%p201_p9), %s1417_s22, 1  ;;  %s1363_s25 = smov (!%p201_p9), [#allocation2]  }
   0xe   : > { %204 = sbr.rel (%p201_p9) target bundleno = 937 (0x3a9), region = 40  ;;  %s1302_s30 = sshll.u32 (!%p201_p9), %s1363_s25, 4  ;;  %s1303_s30 = int_to_ptr.vmem [resolvable:$false] %s1302_s30 }
   0xf   : > { %s1304_s6 = scalar_lea.vmem (!%p201_p9), %s1303_s30, 2048 }
  0x13   : > { %v254_v0 = vld [vmem:[%s1647_s1 + $0x18] sm:$0xff]  ;;  %v253_v1 = vld [vmem:[%s1647_s1 + $0x10] sm:$0xff]  ;;  %v252_v4 = vld [vmem:[%s1647_s1 + $0x8] sm:$0xff]  ;;  %s1461_s15 = scalar_select %p233_p10, %s1417_s22, 1  ;;  %vm255_vm0 = vcmask 261120   ;;  %v1360_v28 = vmov 0.0   ;;  %v617_v49 = vlaneseq }
  0x14   : > { %1093 = vmatprep.subr.mxu0 %v254_v0  ;;  %v400_v2 = vld [vmem:[%s1649_s3 + $0x78] sm:$0xff]  ;;  %v399_v3 = vld [vmem:[%s1649_s3 + $0x70] sm:$0xff]  ;;  %v398_v5 = vld [vmem:[%s1649_s3 + $0x68] sm:$0xff]  ;;  %vm1361_vm1 = vmmov 0   ;;  %v1362_v38 = vmov 0   ;;  %vm677_vm4 = vcmask 523264  }
  0x15   : > { %1094 = vmatpush3.msra.mxu0 %v254_v0  ;;  %1113 = vmatprep.subr.mxu1 %v400_v2  ;;  %v251_v6 = vld [vmem:[%s1647_s1] sm:$0xff]  ;;  %s1029_s26 = sshll.u32 %s1461_s15, 6  ;;  %v396_v11 = vld [vmem:[%s1649_s3 + $0x58] sm:$0xff]  ;;  %v395_v13 = vld [vmem:[%s1649_s3 + $0x50] sm:$0xff]  ;;  %v618_v50 = vshrl.u32 %v617_v49, 7  ;;  %s230_s15 = sand.u32 1, %s1350_s19  }
  0x16   : > { %1095 = vmatprep.subr.mxu0 %v253_v1  ;;  %1114 = vmatpush3.msra.mxu1 %v400_v2  ;;  %s1475_s7 = scalar_lea.vmem %s1646_s0, %s1029_s26  ;;  %v397_v9 = vld [vmem:[%s1649_s3 + $0x60] sm:$0xff]  ;;  %v394_v15 = vld [vmem:[%s1649_s3 + $0x48] sm:$0xff]  ;;  %v392_v19 = vld [vmem:[%s1649_s3 + $0x38] sm:$0xff]  ;;  %s1540_s11 = scalar_lea.vmem %s1650_s4, %s1029_s26 }
  0x17   : > { %1096 = vmatpush3.msra.mxu0 %v253_v1  ;;  %1115 = vmatprep.subr.mxu1 %v399_v3  ;;  %v243_v7 = vld [vmem:[%s1475_s7] sm:$0xff]  ;;  %v244_v8 = vld [vmem:[%s1475_s7 + $0x8] sm:$0xff]  ;;  %v245_v10 = vld [vmem:[%s1475_s7 + $0x10] sm:$0xff]  ;;  %v619_v51 = vsub.s32 0, %v618_v50  ;;  %s1003_s26 = sshll.u32 %s230_s15, 6 }
  0x18   : > { %1097 = vmatprep.subr.mxu0 %v252_v4  ;;  %1116 = vmatpush3.msra.mxu1 %v399_v3  ;;  %v246_v12 = vld [vmem:[%s1475_s7 + $0x18] sm:$0xff]  ;;  %v247_v14 = vld [vmem:[%s1475_s7 + $0x20] sm:$0xff]  ;;  %v248_v16 = vld [vmem:[%s1475_s7 + $0x28] sm:$0xff]  ;;  %s1585_s12 = scalar_lea.vmem [#allocation2], %s1003_s26 }
  0x19   : > { %1098 = vmatpush3.msra.mxu0 %v252_v4  ;;  %1117 = vmatprep.subr.mxu1 %v398_v5  ;;  %v393_v17 = vld [vmem:[%s1649_s3 + $0x40] sm:$0xff]  ;;  %v249_v18 = vld [vmem:[%s1475_s7 + $0x30] sm:$0xff]  ;;  %v250_v20 = vld [vmem:[%s1475_s7 + $0x38] sm:$0xff]  ;;  %s1031_s7 = sshll.u32 %s1417_s22, 10  ;;  %s925_s13 = sshll.u32 %s1585_s12, 4  ;;  %s1600_s13 = int_to_ptr.vmem [resolvable:$true] %s925_s13 }
  0x1a   : > { %1099 = vmatprep.subr.mxu0 %v251_v6  ;;  %1101 = vmatprep.mubr.msk.f32.mxu0 %vm255_vm0, %v243_v7  ;;  %v391_v21 = vld [vmem:[%s1649_s3 + $0x30] sm:$0xff]  ;;  %v390_v22 = vld [vmem:[%s1649_s3 + $0x28] sm:$0xff]  ;;  %v389_v23 = vld [vmem:[%s1649_s3 + $0x20] sm:$0xff]  ;;  %s1598_s17 = scalar_lea.hbm %s1651_s5, %s1031_s7  ;;  %s1606_s22 = scalar_lea.sflag [#allocation3], %s230_s15 }
  0x1b   : > { %1100 = vmatpush3.msra.mxu0 %v251_v6  ;;  %1118 = vmatpush3.msra.mxu1 %v398_v5  ;;  %v388_v24 = vld [vmem:[%s1649_s3 + $0x18] sm:$0xff]  ;;  %v387_v25 = vld [vmem:[%s1649_s3 + $0x10] sm:$0xff]  ;;  %v386_v26 = vld [vmem:[%s1649_s3 + $0x8] sm:$0xff]  ;;  %s1298_s23 = scalar_lea.vmem %s1600_s13, 1024  ;;  %p1305_p0 = scmp.lt.s32.totalorder %s1600_s13, %s1303_s30 }
  0x1c   : > { %1102 = vmatmul.mubr.msk.f32.vlgmr.msra.gmra.mxu0 %vm255_vm0, %v244_v8  ;;  %1119 = vmatprep.subr.mxu1 %v397_v9  ;;  %v385_v27 = vld [vmem:[%s1649_s3] sm:$0xff]  ;;  %v655_v54 = vld [vmem:[%s1540_s11 + $0x10] sm:$0xff]  ;;  %v658_v56 = vld [vmem:[%s1540_s11 + $0x28] sm:$0xff]  ;;  %p1299_p11 = scmp.ne.s32.totalorder %s1600_s13, %s1298_s23  ;;  %p1306_p1 = scmp.lt.s32.totalorder %s1304_s6, %s1298_s23 }
  0x1d   : > { %1104 = vmatprep.mubr.msk.f32.mxu0 %vm255_vm0, %v245_v10  ;;  %1120 = vmatpush3.msra.mxu1 %v397_v9  ;;  %v506_v37 = vld [vmem:[%s1648_s2] sm:$0x1]  ;;  %vm663_vm3 = vcmp.gt.f32.partialorder %v655_v54, 0.0  ;;  %v656_v60 = vld [vmem:[%s1540_s11 + $0x18] sm:$0xff]  ;;  %vm666_vm5 = vcmp.gt.f32.partialorder %v658_v56, 0.0 }
  0x1e   : > { %1121 = vmatprep.subr.mxu1 %v396_v11  ;;  %1157 = vmatprep.subr.mxu0 %v1360_v28  ;;  %vm664_vm7 = vcmp.gt.f32.partialorder %v656_v60, 0.0  ;;  %v657_v3 = vld [vmem:[%s1540_s11 + $0x20] sm:$0xff]  ;;  %p1300_p12 = pnand %p1299_p11, %p1434_p5  ;;  %p1307_p2 = por %p1306_p1, %p1305_p0 }
  0x1f   : > { %1122 = vmatpush3.msra.mxu1 %v396_v11  ;;  %1264 = vset.pattern.permute.xlu0 %v1362_v38  ;;  %v653_v8 = vld [vmem:[%s1540_s11] sm:$0xff]  ;;  %vm665_vm9 = vcmp.gt.f32.partialorder %v657_v3, 0.0 }
  0x20   : > { %1105 = vmatmul.mubr.msk.f32.gmra.mxu0 %vm255_vm0, %v246_v12  ;;  %1123 = vmatprep.subr.mxu1 %v395_v13  ;;  %vm661_vm11 = vcmp.gt.f32.partialorder %v653_v8, 0.0  ;;  %p1301_p13 = pneg %p1300_p12 }
  0x21   : > { %1107 = vmatprep.mubr.msk.f32.mxu0 %vm255_vm0, %v247_v14  ;;  %1124 = vmatpush3.msra.mxu1 %v395_v13 }
  0x22   : > { %1125 = vmatprep.subr.mxu1 %v394_v15  ;;  %1265 = vset.pattern.permute.xlu1 %v1362_v38  ;;  %p1308_p3 = pnand %p1307_p2, %p1301_p13 }
  0x23   : > { %1126 = vmatpush3.msra.mxu1 %v394_v15 }
  0x24   : > { %1108 = vmatmul.mubr.msk.f32.gmra.mxu0 %vm255_vm0, %v248_v16  ;;  %1127 = vmatprep.subr.mxu1 %v393_v17 }
  0x25   : > { %1110 = vmatprep.mubr.msk.f32.mxu0 %vm255_vm0, %v249_v18  ;;  %1128 = vmatpush3.msra.mxu1 %v393_v17  ;;  %v659_v17 = vld [vmem:[%s1540_s11 + $0x30] sm:$0xff] }
  0x26   : > { %1129 = vmatprep.subr.mxu1 %v392_v19  ;;  %vm667_vm13 = vcmp.gt.f32.partialorder %v659_v17, 0.0 }
  0x27   : > { %1130 = vmatpush3.msra.mxu1 %v392_v19 }
  0x28   : > { %1111 = vmatmul.mubr.msk.f32.gmra.mxu0 %vm255_vm0, %v250_v20  ;;  %1131 = vmatprep.subr.mxu1 %v391_v21 }
  0x29   : > { %1132 = vmatpush3.msra.mxu1 %v391_v21  ;;  %1173 = vmatprep.mubr.msk.f32.mxu0 %vm1361_vm1, %v1360_v28 }
  0x2a   : > { %1133 = vmatprep.subr.mxu1 %v390_v22 }
  0x2b   : > { %1134 = vmatpush3.msra.mxu1 %v390_v22  ;;  %v654_v22 = vld [vmem:[%s1540_s11 + $0x8] sm:$0xff] }
  0x2c   : > { %1135 = vmatprep.subr.mxu1 %v389_v23  ;;  %vm662_vm14 = vcmp.gt.f32.partialorder %v654_v22, 0.0 }
  0x2d   : > { %1136 = vmatpush3.msra.mxu1 %v389_v23 }
  0x2e   : > { %1137 = vmatprep.subr.mxu1 %v388_v24 }
  0x2f   : > { %1138 = vmatpush3.msra.mxu1 %v388_v24 }
  0x30   : > { %1139 = vmatprep.subr.mxu1 %v387_v25 }
  0x31   : > { %1140 = vmatpush3.msra.mxu1 %v387_v25 }
  0x32   : > { %1141 = vmatprep.subr.mxu1 %v386_v26 }
  0x33   : > { %1142 = vmatpush3.msra.mxu1 %v386_v26 }
  0x34   : > { %1143 = vmatprep.subr.mxu1 %v385_v27 }
  0x35   : > { %1144 = vmatpush3.msra.mxu1 %v385_v27 }
  0xdc   : > { %v1103_v29 = vpop.f32.mrf.mxu0 }
  0xde   : > { %v346_v30 = vpop.f32.mrf.mxu0 }
  0xdf   : > { %1145 = vmatprep.mubr.f32.mxu1 %v346_v30 }
  0xe0   : > { %v1106_v31 = vpop.f32.mrf.mxu0  ;;  %1146 = vmatmul.mubr.f32.vlgmr.msra.gmra.mxu1 %v1103_v29 }
  0xe2   : > { %v356_v32 = vpop.f32.mrf.mxu0 }
  0xe3   : > { %1148 = vmatprep.mubr.f32.mxu1 %v356_v32 }
  0xe4   : > { %v1109_v33 = vpop.f32.mrf.mxu0  ;;  %1149 = vmatmul.mubr.f32.gmra.mxu1 %v1106_v31 }
  0xe6   : > { %v366_v34 = vpop.f32.mrf.mxu0 }
  0xe7   : > { %1151 = vmatprep.mubr.f32.mxu1 %v366_v34 }
  0xe8   : > { %v1112_v35 = vpop.f32.mrf.mxu0  ;;  %1152 = vmatmul.mubr.f32.gmra.mxu1 %v1109_v33 }
  0xe9   : > { %1158 = vmatpush3.xpose.msra.mxu0 %v1112_v35  ;;  %1204 = vmatprep.subr.mxu1 %v1112_v35 }
  0xea   : > { %v376_v36 = vpop.f32.mrf.mxu0  ;;  %1212 = vmatpush3.msra.mxu1 %v1112_v35  ;;  %1159 = vmatprep.subr.mxu0 %v1360_v28 }
  0xeb   : > { %1154 = vmatprep.mubr.f32.mxu1 %v376_v36  ;;  %1205 = vmatprep.subr.mxu1 %v376_v36 }
  0xec   : > { %1155 = vmatmul.mubr.f32.gmra.mxu1 %v1112_v35 }
  0xed   : > { %1213 = vmatpush3.msra.mxu1 %v376_v36  ;;  %1160 = vmatpush3.xpose.msra.mxu0 %v376_v36 }
  0xee   : > { %1206 = vmatprep.subr.mxu1 %v1109_v33  ;;  %1161 = vmatprep.subr.mxu0 %v1360_v28 }
  0xef   : > { %1214 = vmatpush3.msra.mxu1 %v1109_v33 }
  0xf0   : > { %1207 = vmatprep.subr.mxu1 %v366_v34 }
  0xf1   : > { %1215 = vmatpush3.msra.mxu1 %v366_v34  ;;  %1162 = vmatpush3.xpose.msra.mxu0 %v1109_v33 }
  0xf2   : > { %1208 = vmatprep.subr.mxu1 %v1106_v31  ;;  %1163 = vmatprep.subr.mxu0 %v1360_v28 }
  0xf3   : > { %1216 = vmatpush3.msra.mxu1 %v1106_v31 }
  0xf4   : > { %1209 = vmatprep.subr.mxu1 %v356_v32 }
  0xf5   : > { %1217 = vmatpush3.msra.mxu1 %v356_v32  ;;  %1164 = vmatpush3.xpose.msra.mxu0 %v366_v34 }
  0xf6   : > { %1210 = vmatprep.subr.mxu1 %v1103_v29  ;;  %1165 = vmatprep.subr.mxu0 %v1360_v28 }
  0xf7   : > { %1218 = vmatpush3.msra.mxu1 %v1103_v29 }
  0xf8   : > { %1211 = vmatprep.subr.mxu1 %v346_v30 }
  0xf9   : > { %1219 = vmatpush3.msra.mxu1 %v346_v30  ;;  %1166 = vmatpush3.xpose.msra.mxu0 %v1106_v31 }
  0xfa   : > { %1167 = vmatprep.subr.mxu0 %v1360_v28 }
  0xfd   : > { %1168 = vmatpush3.xpose.msra.mxu0 %v356_v32 }
  0xfe   : > { %1169 = vmatprep.subr.mxu0 %v1360_v28 }
 0x101   : > { %1170 = vmatpush3.xpose.msra.mxu0 %v1103_v29 }
 0x102   : > { %1171 = vmatprep.subr.mxu0 %v1360_v28  ;;  %v660_v28 = vld [vmem:[%s1540_s11 + $0x38] sm:$0xff] }
 0x103   : > { %vm668_vm1 = vcmp.gt.f32.partialorder %v660_v28, 0.0 }
 0x105   : > { %1172 = vmatpush3.xpose.msra.mxu0 %v346_v30 }
 0x106   : > { %1176 = vmatprep.subr.mxu0 %v1112_v35 }
 0x108   : > { %1174 = vmatmul.mubr.f32.vlgmr.msra.gmra.mxu0 %v506_v37 }
 0x109   : > { %1177 = vmatpush3.msra.mxu0 %v1112_v35 }
 0x10a   : > { %1178 = vmatprep.subr.mxu0 %v376_v36 }
 0x10b   : > { %1179 = vmatpush3.msra.mxu0 %v376_v36 }
 0x10c   : > { %1180 = vmatprep.subr.mxu0 %v1109_v33 }
 0x10d   : > { %1181 = vmatpush3.msra.mxu0 %v1109_v33 }
 0x10e   : > { %1182 = vmatprep.subr.mxu0 %v366_v34 }
 0x10f   : > { %1183 = vmatpush3.msra.mxu0 %v366_v34 }
 0x110   : > { %1184 = vmatprep.subr.mxu0 %v1106_v31 }
 0x111   : > { %1185 = vmatpush3.msra.mxu0 %v1106_v31 }
 0x112   : > { %1186 = vmatprep.subr.mxu0 %v356_v32 }
 0x113   : > { %1187 = vmatpush3.msra.mxu0 %v356_v32 }
 0x114   : > { %1188 = vmatprep.subr.mxu0 %v1103_v29 }
 0x115   : > { %1189 = vmatpush3.msra.mxu0 %v1103_v29 }
 0x116   : > { %1190 = vmatprep.subr.mxu0 %v346_v30 }
 0x117   : > { %1191 = vmatpush3.msra.mxu0 %v346_v30 }
 0x1a0   : > { %v1147_v39 = vpop.f32.mrf.mxu1 }
 0x1a2   : > { %v467_v40 = vpop.f32.mrf.mxu1 }
 0x1a4   : > { %v1150_v41 = vpop.f32.mrf.mxu1 }
 0x1a6   : > { %v477_v42 = vpop.f32.mrf.mxu1 }
 0x1a7   : > { %589 = vperm.xlu0 %1264, %v477_v42  }
 0x1a8   : > { %v1153_v43 = vpop.f32.mrf.mxu1 }
 0x1a9   : > { %604 = vperm.xlu1 %1265, %v1153_v43  }
 0x1aa   : > { %v487_v44 = vpop.f32.mrf.mxu1 }
 0x1ab   : > { %594 = vperm.xlu0 %1264, %v1150_v41  }
 0x1ac   : > { %v1156_v45 = vpop.f32.mrf.mxu1 }
 0x1ad   : > { %599 = vperm.xlu1 %1265, %v487_v44  }
 0x1ae   : > { %v497_v46 = vpop.f32.mrf.mxu1 }
 0x1af   : > { %579 = vperm.xlu0 %1264, %v467_v40  }
 0x1b1   : > { %609 = vperm.xlu1 %1265, %v497_v46  }
 0x1b3   : > { %584 = vperm.xlu0 %1264, %v1147_v39  }
 0x1b5   : > { %614 = vperm.xlu1 %1265, %v1156_v45  }
 0x1c8   : > { %v573_v47 = vpop.f32.mrf.mxu0 }
 0x1c9   : > { %v620_v52 = vrot.slane %v573_v47, %v619_v51 }
 0x1ca   : > { %v1175_v48 = vpop.f32.mrf.mxu0 }
 0x222   : > { %v590_v53 = vpop.permute.xlu0 %589 }
 0x223   : > { %v623_v55 = vadd.f32 %v620_v52, %v590_v53 }
 0x224   : > { %v605_v57 = vpop.permute.xlu1 %604 }
 0x225   : > { %v639_v58 = vmul.f32 0.01, %v623_v55  ;;  %v626_v59 = vadd.f32 %v620_v52, %v605_v57  ;;  %vm631_vm2 = vcmp.gt.f32.partialorder %v623_v55, 0.0 }
 0x226   : > { %v595_v61 = vpop.permute.xlu0 %594 }
 0x227   : > { %v642_v62 = vmul.f32 0.01, %v626_v59  ;;  %v624_v63 = vadd.f32 %v620_v52, %v595_v61  ;;  %v647_v0 = vsel %vm631_vm2, %v623_v55, %v639_v58  ;;  %vm634_vm6 = vcmp.gt.f32.partialorder %v626_v59, 0.0 }
 0x228   : > { %v600_v1 = vpop.permute.xlu1 %599  ;;  %v1545_v2 = vsel %vm663_vm3, %v647_v0, -1e+30 }
 0x229   : > { %v640_v4 = vmul.f32 0.01, %v624_v63  ;;  %v625_v5 = vadd.f32 %v620_v52, %v600_v1  ;;  %v684_v6 = vsel %vm677_vm4, %v1545_v2, -inf  ;;  %v650_v7 = vsel %vm634_vm6, %v626_v59, %v642_v62 }
 0x22a   : > { %v580_v9 = vpop.permute.xlu0 %579  ;;  %685 = vmax.xlane.f32.xlu0 %v684_v6  ;;  %v674_v10 = vsel %vm666_vm5, %v650_v7, -1e+30  ;;  %vm632_vm8 = vcmp.gt.f32.partialorder %v624_v63, 0.0 }
 0x22b   : > { %v641_v11 = vmul.f32 0.01, %v625_v5  ;;  %v621_v12 = vadd.f32 %v620_v52, %v580_v9  ;;  %v648_v13 = vsel %vm632_vm8, %v624_v63, %v640_v4  ;;  %v693_v15 = vsel %vm677_vm4, %v674_v10, -inf }
 0x22c   : > { %v610_v14 = vpop.permute.xlu1 %609  ;;  %v672_v16 = vsel %vm664_vm7, %v648_v13, -1e+30  ;;  %vm633_vm10 = vcmp.gt.f32.partialorder %v625_v5, 0.0 }
 0x22d   : > { %v637_v18 = vmul.f32 0.01, %v621_v12  ;;  %v627_v19 = vadd.f32 %v620_v52, %v610_v14  ;;  %v687_v20 = vsel %vm677_vm4, %v672_v16, -inf  ;;  %v649_v21 = vsel %vm633_vm10, %v625_v5, %v641_v11 }
 0x22e   : > { %v585_v23 = vpop.permute.xlu0 %584  ;;  %694 = vmax.xlane.f32.xlu0 %v693_v15  ;;  %688 = vmax.xlane.f32.xlu1 %v687_v20  ;;  %v673_v24 = vsel %vm665_vm9, %v649_v21, -1e+30  ;;  %vm629_vm12 = vcmp.gt.f32.partialorder %v621_v12, 0.0 }
 0x22f   : > { %v643_v25 = vmul.f32 0.01, %v627_v19  ;;  %v622_v26 = vadd.f32 %v620_v52, %v585_v23  ;;  %v645_v27 = vsel %vm629_vm12, %v621_v12, %v637_v18  ;;  %v690_v30 = vsel %vm677_vm4, %v673_v24, -inf }
 0x230   : > { %v615_v29 = vpop.permute.xlu1 %614  ;;  %v669_v31 = vsel %vm661_vm11, %v645_v27, -1e+30  ;;  %vm635_vm15 = vcmp.gt.f32.partialorder %v627_v19, 0.0 }
 0x231   : > { %v638_v32 = vmul.f32 0.01, %v622_v26  ;;  %v628_v33 = vadd.f32 %v620_v52, %v615_v29  ;;  %v678_v34 = vsel %vm677_vm4, %v669_v31, -inf  ;;  %vm630_vm0 = vcmp.gt.f32.partialorder %v622_v26, 0.0 }
 0x232   : > { %691 = vmax.xlane.f32.xlu0 %v690_v30  ;;  %679 = vmax.xlane.f32.xlu1 %v678_v34  ;;  %v651_v35 = vsel %vm635_vm15, %v627_v19, %v643_v25 }
 0x233   : > { %v644_v36 = vmul.f32 0.01, %v628_v33  ;;  %v646_v37 = vsel %vm630_vm0, %v622_v26, %v638_v32  ;;  %v675_v38 = vsel %vm667_vm13, %v651_v35, -1e+30  ;;  %vm636_vm2 = vcmp.gt.f32.partialorder %v628_v33, 0.0 }
 0x234   : > { %v670_v39 = vsel %vm662_vm14, %v646_v37, -1e+30  ;;  %v696_v41 = vsel %vm677_vm4, %v675_v38, -inf }
 0x235   : > { %v681_v40 = vsel %vm677_vm4, %v670_v39, -inf  ;;  %v652_v42 = vsel %vm636_vm2, %v628_v33, %v644_v36 }
 0x236   : > { %682 = vmax.xlane.f32.xlu1 %v681_v40  ;;  %697 = vmax.xlane.f32.xlu0 %v696_v41  ;;  %v676_v43 = vsel %vm668_vm1, %v652_v42, -1e+30 }
 0x237   : > { %v699_v44 = vsel %vm677_vm4, %v676_v43, -inf }
 0x23a   : > { %700 = vmax.xlane.f32.xlu0 %v699_v44 }
 0x2b3   : > { %v686_v45 = vpop.xlane.xlu0 %685 }
 0x2b4   : > { %v704_v46 = vsub.f32 %v1545_v2, %v686_v45 }
 0x2b6   : > { %v714_v47 = vmul.f32 1.442695, %v704_v46 }
 0x2b7   : > { %v695_v48 = vpop.xlane.xlu0 %694  ;;  %v689_v49 = vpop.xlane.xlu1 %688 }
 0x2b8   : > { %1266 = vpow2.f32 %v714_v47  ;;  %v707_v50 = vsub.f32 %v674_v10, %v695_v48  ;;  %v705_v51 = vsub.f32 %v672_v16, %v689_v49 }
 0x2ba   : > { %v716_v52 = vmul.f32 1.442695, %v705_v51  ;;  %v720_v53 = vmul.f32 1.442695, %v707_v50 }
 0x2bb   : > { %v692_v54 = vpop.xlane.xlu0 %691  ;;  %v680_v55 = vpop.xlane.xlu1 %679 }
 0x2bc   : > { %v706_v56 = vsub.f32 %v673_v24, %v692_v54  ;;  %v702_v57 = vsub.f32 %v669_v31, %v680_v55  ;;  %1268 = vpow2.f32 %v716_v52 }
 0x2bd   : > { %1270 = vpow2.f32 %v720_v53 }
 0x2be   : > { %v718_v58 = vmul.f32 1.442695, %v706_v56  ;;  %v710_v59 = vmul.f32 1.442695, %v702_v57 }
 0x2bf   : > { %v698_v60 = vpop.xlane.xlu0 %697  ;;  %v683_v61 = vpop.xlane.xlu1 %682 }
 0x2c0   : > { %1272 = vpow2.f32 %v718_v58  ;;  %v708_v62 = vsub.f32 %v675_v38, %v698_v60  ;;  %v703_v63 = vsub.f32 %v670_v39, %v683_v61 }
 0x2c1   : > { %1274 = vpow2.f32 %v710_v59 }
 0x2c2   : > { %v722_v0 = vmul.f32 1.442695, %v708_v62  ;;  %v712_v1 = vmul.f32 1.442695, %v703_v63 }
 0x2c3   : > { %v701_v2 = vpop.xlane.xlu0 %700 }
 0x2c4   : > { %1276 = vpow2.f32 %v722_v0  ;;  %v709_v3 = vsub.f32 %v676_v43, %v701_v2 }
 0x2c5   : > { %v1267_v4 = vpop.eup %1266  ;;  %1278 = vpow2.f32 %v712_v1 }
 0x2c6   : > { %v724_v5 = vmul.f32 1.442695, %v709_v3  ;;  %1195 = vmatprep.mubr.msk.f32.mxu1 %vm677_vm4, %v1267_v4  ;;  %v732_v13 = vsel %vm677_vm4, %v1267_v4, 0.0 }
 0x2c8   : > { %1280 = vpow2.f32 %v724_v5 }
 0x2c9   : > { %v1269_v6 = vpop.eup %1268 }
 0x2ca   : > { %1196 = vmatmul.mubr.msk.f32.vlgmr.msra.gmra.mxu1 %vm677_vm4, %v1269_v6  ;;  %v1271_v7 = vpop.eup %1270  ;;  %v735_v17 = vsel %vm677_vm4, %v1269_v6, 0.0 }
 0x2cb   : > { %v741_v19 = vsel %vm677_vm4, %v1271_v7, 0.0 }
 0x2cd   : > { %v1273_v8 = vpop.eup %1272 }
 0x2ce   : > { %v1275_v9 = vpop.eup %1274  ;;  %1198 = vmatprep.mubr.msk.f32.mxu1 %vm677_vm4, %v1273_v8  ;;  %v738_v16 = vsel %vm677_vm4, %v1273_v8, 0.0 }
 0x2cf   : > { %1192 = vmatprep.mubr.msk.f32.mxu0 %vm677_vm4, %v1275_v9  ;;  %1199 = vmatmul.mubr.msk.f32.gmra.mxu1 %vm677_vm4, %v1271_v7  ;;  %v726_v10 = vsel %vm677_vm4, %v1275_v9, 0.0 }
 0x2d0   : > { %727 = vadd.xlane.f32.xlu1 %v726_v10 }
 0x2d1   : > { %v1277_v11 = vpop.eup %1276 }
 0x2d2   : > { %v1279_v12 = vpop.eup %1278  ;;  %1201 = vmatprep.mubr.msk.f32.mxu1 %vm677_vm4, %v1277_v11  ;;  %v744_v18 = vsel %vm677_vm4, %v1277_v11, 0.0 }
 0x2d3   : > { %1193 = vmatmul.mubr.msk.f32.vlgmr.msra.gmra.mxu0 %vm677_vm4, %v1279_v12  ;;  %v729_v14 = vsel %vm677_vm4, %v1279_v12, 0.0 }
 0x2d4   : > { %733 = vadd.xlane.f32.xlu1 %v732_v13  ;;  %730 = vadd.xlane.f32.xlu0 %v729_v14 }
 0x2d5   : > { %v1281_v15 = vpop.eup %1280 }
 0x2d6   : > { %1202 = vmatmul.mubr.msk.f32.gmra.mxu1 %vm677_vm4, %v1281_v15  ;;  %v747_v20 = vsel %vm677_vm4, %v1281_v15, 0.0 }
 0x2d8   : > { %739 = vadd.xlane.f32.xlu1 %v738_v16  ;;  %736 = vadd.xlane.f32.xlu0 %v735_v17 }
 0x2dc   : > { %745 = vadd.xlane.f32.xlu1 %v744_v18  ;;  %742 = vadd.xlane.f32.xlu0 %v741_v19 }
 0x2e0   : > { %748 = vadd.xlane.f32.xlu0 %v747_v20 }
 0x359   : > { %v728_v22 = vpop.xlane.xlu1 %727 }
 0x35a   : > { %v750_v33 = vmax.f32 %v728_v22, 1e-30 }
 0x35d   : > { %v731_v21 = vpop.xlane.xlu0 %730  ;;  %v734_v24 = vpop.xlane.xlu1 %733 }
 0x35e   : > { %v752_v27 = vmax.f32 %v734_v24, 1e-30  ;;  %v751_v31 = vmax.f32 %v731_v21, 1e-30 }
 0x361   : > { %v737_v23 = vpop.xlane.xlu0 %736  ;;  %v740_v28 = vpop.xlane.xlu1 %739 }
 0x362   : > { %v753_v25 = vmax.f32 %v737_v23, 1e-30  ;;  %v754_v30 = vmax.f32 %v740_v28, 1e-30 }
 0x364   : > { %1282 = vrcp.f32 %v753_v25 }
 0x365   : > { %v743_v26 = vpop.xlane.xlu0 %742  ;;  %1284 = vrcp.f32 %v752_v27  ;;  %v746_v34 = vpop.xlane.xlu1 %745 }
 0x366   : > { %v755_v29 = vmax.f32 %v743_v26, 1e-30  ;;  %v756_v36 = vmax.f32 %v746_v34, 1e-30 }
 0x368   : > { %1286 = vrcp.f32 %v755_v29 }
 0x369   : > { %v749_v32 = vpop.xlane.xlu0 %748  ;;  %1288 = vrcp.f32 %v754_v30 }
 0x36a   : > { %v757_v35 = vmax.f32 %v749_v32, 1e-30  ;;  %1290 = vrcp.f32 %v751_v31 }
 0x36b   : > { %1292 = vrcp.f32 %v750_v33 }
 0x36c   : > { %1294 = vrcp.f32 %v757_v35 }
 0x36d   : > { %1296 = vrcp.f32 %v756_v36 }
 0x371   : > { %v1283_v37 = vpop.eup %1282 }
 0x372   : > { %v1285_v40 = vpop.eup %1284 }
 0x375   : > { %v1287_v43 = vpop.eup %1286 }
 0x376   : > { %v1289_v46 = vpop.eup %1288 }
 0x377   : > { %v1291_v49 = vpop.eup %1290 }
 0x378   : > { %v1293_v52 = vpop.eup %1292 }
 0x379   : > { %v1295_v54 = vpop.eup %1294 }
 0x37a   : > { %v1297_v58 = vpop.eup %1296 }
 0x38a   : > { %v1197_v38 = vpop.f32.mrf.mxu1 }
 0x38b   : > { %v898_v39 = vmul.f32 %v1283_v37, %v1197_v38 }
 0x38c   : > { %v858_v41 = vpop.f32.mrf.mxu1 }
 0x38d   : > { %906 = vst [vmem:[%s1585_s12 + $0x18] sm:$0xff] %v898_v39  ;;  %v897_v42 = vmul.f32 %v1285_v40, %v858_v41 }
 0x38f   : > { %v1200_v44 = vpop.f32.mrf.mxu1  ;;  %905 = vst [vmem:[%s1585_s12 + $0x10] sm:$0xff] %v897_v42 }
 0x390   : > { %v900_v45 = vmul.f32 %v1287_v43, %v1200_v44 }
 0x391   : > { %v868_v47 = vpop.f32.mrf.mxu1 }
 0x392   : > { %908 = vst [vmem:[%s1585_s12 + $0x28] sm:$0xff] %v900_v45  ;;  %v899_v48 = vmul.f32 %v1289_v46, %v868_v47 }
 0x393   : > { %v1194_v50 = vpop.f32.mrf.mxu0 }
 0x394   : > { %907 = vst [vmem:[%s1585_s12 + $0x20] sm:$0xff] %v899_v48  ;;  %v896_v51 = vmul.f32 %v1291_v49, %v1194_v50 }
 0x395   : > { %v848_v53 = vpop.f32.mrf.mxu0 }
 0x396   : > { %904 = vst [vmem:[%s1585_s12 + $0x8] sm:$0xff] %v896_v51  ;;  %v895_v55 = vmul.f32 %v1293_v52, %v848_v53  ;;  %v1203_v56 = vpop.f32.mrf.mxu1 }
 0x397   : > { %v902_v57 = vmul.f32 %v1295_v54, %v1203_v56 }
 0x398   : > { %903 = vst [vmem:[%s1585_s12] sm:$0xff] %v895_v55  ;;  %v878_v59 = vpop.f32.mrf.mxu1 }
 0x399   : > { %910 = vst [vmem:[%s1585_s12 + $0x38] sm:$0xff] %v902_v57  ;;  %v901_v60 = vmul.f32 %v1297_v58, %v878_v59 }
 0x39b   : > { %909 = vst [vmem:[%s1585_s12 + $0x30] sm:$0xff] %v901_v60 }
 0x39c   : > { %1311 = shalt.err (!%p1308_p3)
}
 0x39d   : > { %s1312_s8 = scalar_lea.hbm %s1598_s17, 1024  ;;  %s1316_s11 = scalar_lea.hbm %s1651_s5, 2048 }
 0x39e   : > { %p1313_p4 = scmp.ne.s32.totalorder %s1598_s17, %s1312_s8  ;;  %p1317_p9 = scmp.lt.s32.totalorder %s1598_s17, %s1651_s5 }
 0x39f   : > { %p1318_p10 = scmp.lt.s32.totalorder %s1316_s11, %s1312_s8 }
 0x3a0   : > { %p1314_p7 = pnand %p1313_p4, %p1434_p5 }
 0x3a1   : > { %p1319_p11 = por %p1318_p10, %p1317_p9 }
 0x3a2   : > { %p1315_p8 = pneg %p1314_p7 }
 0x3a4   : > { %p1320_p12 = pnand %p1319_p11, %p1315_p8 }
 0x3a6   : > { %1323 = shalt.err (!%p1320_p12)
}
 0x3a7   : > { %s1364_s12 = smov 128   ;;  %s1365_s7 = smov 8  }
 0x3a8   : > { %1220 = dma.vmem_to_hbm [thread:$0]  (%p1434_p5), %s1600_s13, 1024, %s1598_s17, %s1606_s22, %s1364_s12, %s1364_s12, %s1365_s7  }
 0x3a9 PF: > { %p1226_p13 = scmp.ge.s32.totalorder %s1358_s21, 2  ;;  %s940_s14 = sand.u32 1, %s1346_s18  }
 0x3aa   : > { %s941_s16 = scalar_lea.sflag [#allocation3], %s940_s14 }
 0x3ab   : > { %p1223_p0 = pnand %p1226_p13, %p1438_p6 }
 0x3ad   : > { %p1224_p1 = pneg %p1223_p0 }
 0x3af   : > { %1341 = dma.done.wait (%p1224_p1), %s941_s16, 1024  }
 0x3b0   : > { %1343 = vsyncadd (%p1224_p1), %s941_s16, 4294966272  ;;  %p15_p2 = scmp.ge.s32.totalorder %s1421_s24, 4   ;;  %s1654_s18 = smov %s1350_s19 }
 0x3b1   : > { %s1655_s19 = smov %s1354_s20  ;;  %s1656_s20 = smov %s1432_s27 }
 0x3b2   : > { %s1657_s21 = smov %s1421_s24  ;;  %17 = sbr.rel (!%p15_p2) target bundleno = 3 (0x3), region = 78 }
 0x3b7   :  { %946 = vsyncpa [#allocation3], 1 }
 0x3b8   :  { %948 = vsyncpa [#allocation3 + $0x1], 1 }

</bundles_post_ra>
